<compile_context>
chip_gen: v6e
topology: v6e:2x2x1
jax: 0.10.0
libtpu: 0.0.40
codegen_flags: <defaults>
</compile_context>

<pallas_src>
import math

import jax
import jax.numpy as jnp
from jax.experimental import pallas as pl
from jax.experimental.pallas import tpu as pltpu


_SMALL_BYTES = 64 * 1024            # below this, plain jnp beats any kernel launch
_TWO_CORE_MIN_BYTES = 2 * 1024 * 1024   # above this, keep grid >= 2 (v7x 2 TCs)
_VMEM_CAP_FALLBACK = 64 * 1024 * 1024   # most conservative physical VMEM (v7x/TC)

_VMEM_CAP = None


def _vmem_capacity_bytes():
    """Physical VMEM of this generation (v5e/v6e 128 MiB, v7x 64 MiB per TC)."""
    global _VMEM_CAP
    if _VMEM_CAP is None:
        cap = None
        try:
            cap = int(pltpu.get_tpu_info().vmem_capacity_bytes)
        except Exception:
            cap = None
        _VMEM_CAP = cap if (cap is not None and cap > 0) else _VMEM_CAP_FALLBACK
    return _VMEM_CAP


def _scale_kernel(x_ref, mean_ref, inv_ref, o_ref):
    x = x_ref[...].astype(jnp.float32)   # (T, W) tile, upcast in VMEM
    mu = mean_ref[...]                   # (1, W) f32, broadcast over rows
    inv = inv_ref[...]                   # (1, W) f32 precomputed 1/(scale+eps)
    o_ref[...] = ((x - mu) * inv).astype(o_ref.dtype)


def _choose_fold(rows, feat):
    """Fold factor k (k | rows): how many feature rows to fold into the lane axis.

    Prefers the exact fold (width multiple of 128 -> unmasked vst).  If the row
    count is ragged, picks the divisor of `rows` whose folded width wastes the
    fewest lanes -- still a free contiguous reshape, no extra HBM passes.
    """
    k_exact = 128 // math.gcd(feat, 128)
    if rows % k_exact == 0:
        return k_exact

    cap = max(4 * k_exact, 64)

    def eff(kk):
        w = feat * kk
        return w / (((w + 127) // 128) * 128)

    best_k, best_eff = 1, eff(1)
    d = 1
    while d * d <= rows:
        if rows % d == 0:
            for cand in (d, rows // d):
                if 1 < cand <= cap:
                    e = eff(cand)
                    if e > best_eff + 1e-12 or (abs(e - best_eff) <= 1e-12
                                                and cand < best_k):
                        best_k, best_eff = cand, e
        d += 1
    return best_k


def _block_plan(width, r, in_itemsize):
    """Row-tile size + explicit VMEM limit, sized from the true footprint.

    Returns (tile_rows, vmem_limit_bytes) or None if no sane tiling fits
    (caller falls back to plain jnp).
    """
    vmem_cap = _vmem_capacity_bytes()
    small_vmem = vmem_cap <= 64 * 1024 * 1024          # v7x-class: 64 MiB / TC
    if small_vmem:
        tgt_in = (8 if in_itemsize >= 4 else 6) * 1024 * 1024
    else:                                              # v5e / v6e: 128 MiB
        tgt_in = 4 * 1024 * 1024

    row_in = width * in_itemsize
    row_out = width * 4                                # output is always f32

    # Smallest legal tile is 8 rows (or full extent); bail out if even that is
    # too big for a comfortable double-buffered pipeline.
    min_rows = min(8, r)
    if min_rows * (2 * row_in + 2 * row_out) > int(vmem_cap * 0.6):
        return None

    tr = (tgt_in // row_in) // 8 * 8
    if tr == 0:
        tr = 8
    total_in = r * row_in
    if tr >= r:
        if total_in >= _TWO_CORE_MIN_BYTES and r >= 16:
            # keep grid >= 2 so both v7x TensorCores get a block
            half = (((r + 1) // 2) + 7) // 8 * 8
            tr = half if half < r else r
        else:
            tr = r
    tile_rows = max(1, min(tr, r))

    # double-buffered in + double-buffered f32 out + params, plus margin
    foot = tile_rows * (2 * row_in + 2 * row_out) + 4 * row_out
    limit = foot + foot // 4 + (8 << 20)
    limit = max(limit, 32 << 20)
    limit = min(limit, vmem_cap * 3 // 4)
    return tile_rows, int(limit)


def _pallas_scale_2d(x2, mean_row, inv_row, tile_rows, vmem_limit):
    rows, width = x2.shape
    grid = (pl.cdiv(rows, tile_rows),)
    return pl.pallas_call(
        _scale_kernel,
        out_shape=jax.ShapeDtypeStruct((rows, width), jnp.float32),
        grid_spec=pltpu.PrefetchScalarGridSpec(
            num_scalar_prefetch=0,
            grid=grid,
            in_specs=[
                pl.BlockSpec((tile_rows, width), lambda i: (i, 0)),
                pl.BlockSpec((1, width), lambda i: (0, 0)),
                pl.BlockSpec((1, width), lambda i: (0, 0)),
            ],
            out_specs=pl.BlockSpec((tile_rows, width), lambda i: (i, 0)),
        ),
        compiler_params=pltpu.CompilerParams(
            dimension_semantics=("parallel",),
            vmem_limit_bytes=vmem_limit),
    )(x2, mean_row, inv_row)


@jax.jit
def _scale_var_pallas(x, mean, scale):
    """(x - mean) / (scale + 1e-7) broadcast along the last dim."""
    orig_shape = x.shape
    feat = orig_shape[-1]
    rows = math.prod(orig_shape[:-1])

    mean_f = mean.reshape(-1).astype(jnp.float32)
    inv_f = 1.0 / (scale.reshape(-1).astype(jnp.float32) + 1e-7)

    in_bytes = x.size * x.dtype.itemsize
    if rows == 0 or in_bytes < _SMALL_BYTES:
        # Tiny or empty key: XLA's fused elementwise pass beats a kernel launch.
        return (x.astype(jnp.float32) - mean_f) * inv_f

    # Lane-dense layout: fold k feature rows into the lane axis (free reshape).
    k = _choose_fold(rows, feat)
    width = feat * k
    r = rows // k

    plan = _block_plan(width, r, x.dtype.itemsize)
    if plan is None:
        return (x.astype(jnp.float32) - mean_f) * inv_f
    tile_rows, vmem_limit = plan

    if k > 1:
        mean_row = jnp.tile(mean_f, k).reshape(1, width)
        inv_row = jnp.tile(inv_f, k).reshape(1, width)
    else:
        mean_row = mean_f.reshape(1, width)
        inv_row = inv_f.reshape(1, width)

    x2 = x.reshape(r, width)     # contiguous view; no dtype cast
    out2 = _pallas_scale_2d(x2, mean_row, inv_row, tile_rows, vmem_limit)
    return out2.reshape(orig_shape)


class Scaler:
    """JAX/Pallas port of uwnet.normalization.Scaler.

    Normalizes each entry of a dict of arrays along its final dimension using
    per-key `mean` and `scale` parameters; keys without parameters pass
    through untouched.  Output dtype of normalized keys is float32 (mirrors
    the PyTorch float64 -> .float() behavior).
    """

    def __init__(self, mean=None, scale=None):
        self.mean = dict(mean or {})
        self.scale = dict(scale or {})

    def __call__(self, x):
        out = {}
        for key in x:
            if key in self.scale and key in self.mean:
                out[key] = _scale_var_pallas(x[key], self.mean[key],
                                             self.scale[key])
            else:
                out[key] = x[key]
        return out


if __name__ == "__main__":
    key = jax.random.PRNGKey(0)
    keys = jax.random.split(key, 16)

    # qt: f32, feat=34  -> exact fold (k=64, W=2176), Pallas path
    # sl: bf16, feat=34 -> exact fold, bf16-read / f32-write Pallas path
    # w:  f32, ragged rows, feat=48 -> divisor (partial) fold Pallas path
    # q/u: tiny keys     -> plain-jnp fallback path
    # t:  no params      -> passthrough
    # e:  empty leading dim -> empty guard
    feat_a, feat_w, feat_q = 34, 48, 32

    mean = {
        "qt": jax.random.normal(keys[0], (feat_a,), jnp.float32),
        "sl": jax.random.normal(keys[1], (feat_a,), jnp.float32),
        "w":  jax.random.normal(keys[2], (feat_w,), jnp.float32),
        "q":  jax.random.normal(keys[3], (feat_q,), jnp.float32),
        "u":  jax.random.normal(keys[4], (feat_q,), jnp.float32),
        "e":  jax.random.normal(keys[5], (feat_q,), jnp.float32),
    }
    scale = {
        "qt": jnp.abs(jax.random.normal(keys[6], (feat_a,), jnp.float32)) + 0.5,
        "sl": jnp.abs(jax.random.normal(keys[7], (feat_a,), jnp.float32)) + 0.5,
        "w":  jnp.abs(jax.random.normal(keys[8], (feat_w,), jnp.float32)) + 0.5,
        "q":  jnp.abs(jax.random.normal(keys[9], (feat_q,), jnp.float32)) + 0.5,
        "u":  jnp.abs(jax.random.normal(keys[10], (feat_q,), jnp.float32)) + 0.5,
        "e":  jnp.abs(jax.random.normal(keys[11], (feat_q,), jnp.float32)) + 0.5,
    }

    scaler = Scaler(mean=mean, scale=scale)

    x = {
        "qt": jax.random.normal(keys[12], (8, 128, feat_a), jnp.float32),
        "sl": jax.random.normal(keys[13], (8, 128, feat_a),
                                jnp.float32).astype(jnp.bfloat16),
        "w":  jax.random.normal(keys[14], (3, 171, feat_w), jnp.float32),
        "q":  jax.random.normal(keys[15], (2, 8, feat_q), jnp.float32),
        "u":  jax.random.normal(keys[0], (4, 16, feat_q),
                                jnp.float32).astype(jnp.bfloat16),
        "t":  jax.random.normal(keys[1], (2, 8, feat_q), jnp.float32),
        "e":  jnp.zeros((0, 8, feat_q), jnp.float32),
    }

    out = scaler(x)
    jax.block_until_ready(out)

    # Reference check (plain JAX, f32, true divide).
    def ref(name):
        xf = x[name].astype(jnp.float32)
        return (xf - mean[name]) / (scale[name] + 1e-7)

    for name in ("qt", "sl", "w", "q", "u", "e"):
        assert out[name].shape == x[name].shape
        assert out[name].dtype == jnp.float32
        assert jnp.allclose(out[name], ref(name), atol=1e-5, rtol=1e-5)
    assert jnp.array_equal(out["t"], x["t"])  # passthrough key untouched

    print("KERNEL_OK")
</pallas_src>

<mosaic_0001>
module attributes {stable_mosaic.version = 11 : i64} {
  func.func @_scale_kernel(%arg0: i32, %arg1: memref<16x2176xf32, #tpu.memory_space<vmem>>, %arg2: memref<1x2176xf32, #tpu.memory_space<vmem>>, %arg3: memref<1x2176xf32, #tpu.memory_space<vmem>>, %arg4: memref<16x2176xf32, #tpu.memory_space<vmem>>) attributes {dimension_semantics = [#tpu.dimension_semantics<parallel>], iteration_bounds = array<i64: 1>, scalar_prefetch = 0 : i64, scratch_operands = 0 : i64, tpu.core_type = #tpu.core_type<tc>, window_params = [{transform_indices = @transform_0, window_bounds = array<i64: 16, 2176>}, {pipeline_mode = #tpu.pipeline_mode<synchronous>, transform_indices = @transform_1, window_bounds = array<i64: 1, 2176>}, {pipeline_mode = #tpu.pipeline_mode<synchronous>, transform_indices = @transform_2, window_bounds = array<i64: 1, 2176>}, {transform_indices = @transform_3, window_bounds = array<i64: 16, 2176>}]} {
    %c0 = arith.constant 0 : index
    %c0_0 = arith.constant 0 : index
    %0 = vector.load %arg1[%c0, %c0_0] : memref<16x2176xf32, #tpu.memory_space<vmem>>, vector<16x2176xf32>
    %c0_1 = arith.constant 0 : index
    %c0_2 = arith.constant 0 : index
    %1 = vector.load %arg2[%c0_1, %c0_2] : memref<1x2176xf32, #tpu.memory_space<vmem>>, vector<1x2176xf32>
    %c0_3 = arith.constant 0 : index
    %c0_4 = arith.constant 0 : index
    %2 = vector.load %arg3[%c0_3, %c0_4] : memref<1x2176xf32, #tpu.memory_space<vmem>>, vector<1x2176xf32>
    %3 = vector.broadcast %1 : vector<1x2176xf32> to vector<16x2176xf32>
    %4 = arith.subf %0, %3 : vector<16x2176xf32>
    %5 = vector.broadcast %2 : vector<1x2176xf32> to vector<16x2176xf32>
    %6 = arith.mulf %4, %5 : vector<16x2176xf32>
    %c0_5 = arith.constant 0 : index
    %c0_6 = arith.constant 0 : index
    %7 = vector.load %arg4[%c0_5, %c0_6] : memref<16x2176xf32, #tpu.memory_space<vmem>>, vector<16x2176xf32>
    tpu.vector_store %arg4[%c0_5, %c0_6], %6 {strides = array<i32>} : memref<16x2176xf32, #tpu.memory_space<vmem>>, vector<16x2176xf32>,
    return
  }
  func.func @transform_0(%arg0: i32) -> (i32, i32) {
    %c0_i32 = arith.constant 0 : i32
    %c0_i32_0 = arith.constant 0 : i32
    return %arg0, %c0_i32 : i32, i32
  }
  func.func @transform_1(%arg0: i32) -> (i32, i32) {
    %c0_i32 = arith.constant 0 : i32
    %c0_i32_0 = arith.constant 0 : i32
    %c0_i32_1 = arith.constant 0 : i32
    return %c0_i32, %c0_i32_0 : i32, i32
  }
  func.func @transform_2(%arg0: i32) -> (i32, i32) {
    %c0_i32 = arith.constant 0 : i32
    %c0_i32_0 = arith.constant 0 : i32
    %c0_i32_1 = arith.constant 0 : i32
    return %c0_i32, %c0_i32_0 : i32, i32
  }
  func.func @transform_3(%arg0: i32) -> (i32, i32) {
    %c0_i32 = arith.constant 0 : i32
    %c0_i32_0 = arith.constant 0 : i32
    return %arg0, %c0_i32 : i32, i32
  }
}

</mosaic_0001>

<bundles_post_ra>
// kernel: tile.18
= control target key start
LH: loop header
LB: loop body
LE: loop exit
PB: predicated region body
PF: predicated region fallthrough
CT: control target
= control target key end

     0   :  { %s64_s0 = inlined_call_operand.vmem [shape: f32[34], index: 0, kind: input, shape index: {}]   ;;  %s65_s1 = inlined_call_operand.vmem [shape: f32[64,34], index: 1, kind: output, shape index: {}]  }
   0x1   :  { %v4_v0 = vld [vmem:[%s64_s0] ss:$0 sm:$0xff] }
   0x2   :  { %5 = vst [vmem:[%s65_s1] sm:$0xff] %v4_v0  ;;  %20 = vst [vmem:[%s65_s1 + $0x8] sm:$0xff] %v4_v0 }
   0x3   :  { %21 = vst [vmem:[%s65_s1 + $0x10] sm:$0xff] %v4_v0  ;;  %22 = vst [vmem:[%s65_s1 + $0x18] sm:$0xff] %v4_v0 }
   0x4   :  { %23 = vst [vmem:[%s65_s1 + $0x20] sm:$0xff] %v4_v0  ;;  %24 = vst [vmem:[%s65_s1 + $0x28] sm:$0xff] %v4_v0 }
   0x5   :  { %25 = vst [vmem:[%s65_s1 + $0x30] sm:$0xff] %v4_v0  ;;  %26 = vst [vmem:[%s65_s1 + $0x38] sm:$0xff] %v4_v0 }

// kernel: tile.19
= control target key start
LH: loop header
LB: loop body
LE: loop exit
PB: predicated region body
PF: predicated region fallthrough
CT: control target
= control target key end

     0   :  { %vm1245_vm0 = vcmask 15360   ;;  %vm37_vm1 = vcmask 48128   ;;  %s847_s14 = smov 126   ;;  %vm1246_vm2 = vcmask 31744   ;;  %s848_s19 = smov 122   ;;  %vm51_vm3 = vcmask 64512   ;;  %s1243_s0 = inlined_call_operand.vmem [shape: f32[64,34], index: 0, kind: input, shape index: {}]   ;;  %s1244_s1 = inlined_call_operand.vmem [shape: f32[1,2176], index: 1, kind: output, shape index: {}]  }
   0x1   :  { %v689_v0 = vld [vmem:[%s1243_s0 + $0xf] sm:$0x1]   ;;  %v693_v3 = vld [vmem:[%s1243_s0 + $0x2d] sm:$0x1]   ;;  %v691_v6 = vld [vmem:[%s1243_s0 + $0x1e] sm:$0x1]  }
   0x2   :  { %v690_v1 = vld [vmem:[%s1243_s0 + $0xf] sm:$0x1]   ;;  %v694_v4 = vld [vmem:[%s1243_s0 + $0x2d] sm:$0x1]   ;;  %v692_v7 = vld [vmem:[%s1243_s0 + $0x1e] sm:$0x1]  }
   0x3   :  { %v10_v2 = vsel %vm1245_vm0, %v690_v1, %v689_v0  ;;  %v38_v5 = vsel %vm37_vm1, %v694_v4, %v693_v3  ;;  %v24_v8 = vsel %vm1246_vm2, %v692_v7, %v691_v6  ;;  %v695_v9 = vld [vmem:[%s1243_s0 + $0x3c] sm:$0x1]   ;;  %v697_v12 = vld [vmem:[%s1243_s0 + $0xb] sm:$0x1]   ;;  %vm65_vm4 = vcmask 80896   ;;  %s849_s3 = smov 124  }
   0x4   :  { %11 = vrot.lane.b32.xlu0 %v10_v2, %s847_s14  ;;  %39 = vrot.lane.b32.xlu1 %v38_v5, %s848_s19  ;;  %v696_v10 = vld [vmem:[%s1243_s0 + $0x3c] sm:$0x1]   ;;  %v698_v13 = vld [vmem:[%s1243_s0 + $0xb] sm:$0x1]   ;;  %vm79_vm5 = vcmask 97280   ;;  %s850_s4 = smov 120  }
   0x5   :  { %v52_v11 = vsel %vm51_vm3, %v696_v10, %v695_v9  ;;  %v699_v14 = vld [vmem:[%s1243_s0 + $0x1a] sm:$0x1]   ;;  %v66_v16 = vsel %vm65_vm4, %v698_v13, %v697_v12  ;;  %v701_v18 = vld [vmem:[%s1243_s0 + $0x29] sm:$0x1]   ;;  %vm93_vm6 = vcmask 113664   ;;  %vm107_vm7 = vcmask 130048  }
   0x6   :  { %v700_v15 = vld [vmem:[%s1243_s0 + $0x1a] sm:$0x1]   ;;  %v702_v19 = vld [vmem:[%s1243_s0 + $0x29] sm:$0x1]   ;;  %v703_v20 = vld [vmem:[%s1243_s0 + $0x38] sm:$0x1]  }
   0x7   :  { %v80_v17 = vsel %vm79_vm5, %v700_v15, %v699_v14  ;;  %v704_v21 = vld [vmem:[%s1243_s0 + $0x38] sm:$0x1]   ;;  %s851_s13 = smov 118   ;;  %s852_s14 = smov 116   ;;  %v94_v22 = vsel %vm93_vm6, %v702_v19, %v701_v18  ;;  %vm111_vm8 = vcmask 146432   ;;  %vm97_vm9 = vcmask 162816  }
   0x8   :  { %25 = vrot.lane.b32.xlu0 %v24_v8, %s849_s3  ;;  %53 = vrot.lane.b32.xlu1 %v52_v11, %s850_s4  ;;  %v108_v23 = vsel %vm107_vm7, %v704_v21, %v703_v20  ;;  %v705_v24 = vld [vmem:[%s1243_s0 + $0x7] sm:$0x1]   ;;  %v707_v26 = vld [vmem:[%s1243_s0 + $0x16] sm:$0x1]   ;;  %s853_s23 = smov 114   ;;  %s854_s24 = smov 112  }
   0x9   :  { %v706_v25 = vld [vmem:[%s1243_s0 + $0x7] sm:$0x1]   ;;  %v708_v27 = vld [vmem:[%s1243_s0 + $0x16] sm:$0x1]   ;;  %vm83_vm10 = vcmask 179200   ;;  %vm69_vm11 = vcmask 195584  }
   0xa   :  { %v122_v28 = vsel %vm111_vm8, %v706_v25, %v705_v24  ;;  %v136_v29 = vsel %vm97_vm9, %v708_v27, %v707_v26  ;;  %v709_v30 = vld [vmem:[%s1243_s0 + $0x25] sm:$0x1]   ;;  %v711_v32 = vld [vmem:[%s1243_s0 + $0x34] sm:$0x1]   ;;  %s855_s4 = smov 110   ;;  %s856_s5 = smov 108  }
   0xb   :  { %v710_v31 = vld [vmem:[%s1243_s0 + $0x25] sm:$0x1]   ;;  %v712_v33 = vld [vmem:[%s1243_s0 + $0x34] sm:$0x1]   ;;  %vm55_vm12 = vcmask 211968   ;;  %vm41_vm13 = vcmask 228352  }
   0xc   :  { %67 = vrot.lane.b32.xlu0 %v66_v16, %s851_s13  ;;  %81 = vrot.lane.b32.xlu1 %v80_v17, %s852_s14  ;;  %v150_v34 = vsel %vm83_vm10, %v710_v31, %v709_v30  ;;  %v164_v35 = vsel %vm69_vm11, %v712_v33, %v711_v32  ;;  %v713_v36 = vld [vmem:[%s1243_s0 + $0x3] sm:$0x1]   ;;  %v715_v38 = vld [vmem:[%s1243_s0 + $0x12] sm:$0x1]   ;;  %s857_s14 = smov 106   ;;  %s858_s15 = smov 104  }
   0xd   :  { %v714_v37 = vld [vmem:[%s1243_s0 + $0x3] sm:$0x1]   ;;  %v716_v39 = vld [vmem:[%s1243_s0 + $0x12] sm:$0x1]   ;;  %vm27_vm14 = vcmask 244736   ;;  %vm13_vm15 = vcmask 261120  }
   0xe   :  { %v178_v40 = vsel %vm55_vm12, %v714_v37, %v713_v36  ;;  %v191_v41 = vsel %vm41_vm13, %v716_v39, %v715_v38  ;;  %v717_v42 = vld [vmem:[%s1243_s0 + $0x21] sm:$0x1]   ;;  %v719_v44 = vld [vmem:[%s1243_s0 + $0x30] sm:$0x1]   ;;  %s860_s25 = smov 100   ;;  %s861_s26 = smov 98  }
   0xf   :  { %v718_v43 = vld [vmem:[%s1243_s0 + $0x21] sm:$0x1]   ;;  %v720_v45 = vld [vmem:[%s1243_s0 + $0x30] sm:$0x1]   ;;  %s862_s27 = smov 96   ;;  %s863_s3 = smov 94  }
  0x10   :  { %95 = vrot.lane.b32.xlu0 %v94_v22, %s853_s23  ;;  %109 = vrot.lane.b32.xlu1 %v108_v23, %s854_s24  ;;  %s859_s24 = smov 102   ;;  %v205_v46 = vsel %vm27_vm14, %v718_v43, %v717_v42  ;;  %v219_v47 = vsel %vm13_vm15, %v720_v45, %v719_v44  ;;  %v721_v48 = vld [vmem:[%s1243_s0 + $0x3f] sm:$0x1]   ;;  %v722_v49 = vld [vmem:[%s1243_s0 + $0xe] sm:$0x1]   ;;  %s865_s9 = smov 90  }
  0x11   :  { %v723_v50 = vld [vmem:[%s1243_s0 + $0x1d] sm:$0x1]   ;;  %v724_v51 = vld [vmem:[%s1243_s0 + $0x2c] sm:$0x1]   ;;  %s866_s10 = smov 88   ;;  %s867_s17 = smov 86  }
  0x12   :  { %v725_v52 = vld [vmem:[%s1243_s0 + $0x3b] sm:$0x1]   ;;  %v726_v53 = vld [vmem:[%s1243_s0 + $0xa] sm:$0x1]   ;;  %v2_v54 = vld [vmem:[%s1243_s0] sm:$0x1]  }
  0x13   :  { %vm3_vm0 = vcmask 277504   ;;  %s868_s18 = smov 84   ;;  %v727_v55 = vld [vmem:[%s1243_s0 + $0x19] sm:$0x1]   ;;  %v728_v56 = vld [vmem:[%s1243_s0 + $0x28] sm:$0x1]  }
  0x14   :  { %123 = vrot.lane.b32.xlu0 %v122_v28, %s855_s4  ;;  %137 = vrot.lane.b32.xlu1 %v136_v29, %s856_s5  ;;  %s864_s4 = smov 92   ;;  %4 = vst.msk [vmem:[#allocation0] sm:$0x1] %vm3_vm0, %v2_v54   ;;  %s869_s23 = smov 82   ;;  %v729_v57 = vld [vmem:[%s1243_s0 + $0x37] sm:$0x1]  }
  0x15   :  { %v730_v58 = vld [vmem:[%s1243_s0 + $0x6] sm:$0x1]   ;;  %s871_s29 = smov 78   ;;  %s872_s30 = smov 76   ;;  %v731_v59 = vld [vmem:[%s1243_s0 + $0x15] sm:$0x1]  }
  0x16   :  { %v732_v60 = vld [vmem:[%s1243_s0 + $0x24] sm:$0x1]   ;;  %s873_s6 = smov 74   ;;  %s874_s7 = smov 72   ;;  %v733_v61 = vld [vmem:[%s1243_s0 + $0x33] sm:$0x1]  }
  0x17   :  { %v734_v62 = vld [vmem:[%s1243_s0 + $0x2] sm:$0x1]   ;;  %s875_s12 = smov 70   ;;  %s876_s13 = smov 68   ;;  %v735_v63 = vld [vmem:[%s1243_s0 + $0x11] sm:$0x1]  }
  0x18   :  { %151 = vrot.lane.b32.xlu0 %v150_v34, %s857_s14  ;;  %165 = vrot.lane.b32.xlu1 %v164_v35, %s858_s15  ;;  %v736_v0 = vld [vmem:[%s1243_s0 + $0x20] sm:$0x1]   ;;  %s878_s19 = smov 64   ;;  %v737_v1 = vld [vmem:[%s1243_s0 + $0x2f] sm:$0x1]   ;;  %s882_s2 = smov 56  }
  0x19   :  { %v738_v2 = vld [vmem:[%s1243_s0 + $0x3e] sm:$0x1]   ;;  %v739_v3 = vld [vmem:[%s1243_s0 + $0xd] sm:$0x1]   ;;  %v740_v4 = vld [vmem:[%s1243_s0 + $0x1c] sm:$0x1]  }
  0x1a   :  { %v741_v5 = vld [vmem:[%s1243_s0 + $0x2b] sm:$0x1]   ;;  %v742_v6 = vld [vmem:[%s1243_s0 + $0x3a] sm:$0x1]   ;;  %s884_s8 = smov 52   ;;  %s886_s14 = smov 48  }
  0x1b   :  { %v743_v7 = vld [vmem:[%s1243_s0 + $0x9] sm:$0x1]   ;;  %v744_v8 = vld [vmem:[%s1243_s0 + $0x18] sm:$0x1]   ;;  %v745_v9 = vld [vmem:[%s1243_s0 + $0x27] sm:$0x1]  }
  0x1c   :  { %179 = vrot.lane.b32.xlu0 %v178_v40, %s859_s24  ;;  %192 = vrot.lane.b32.xlu1 %v191_v41, %s860_s25  ;;  %s870_s24 = smov 80   ;;  %s880_s25 = smov 60   ;;  %v746_v10 = vld [vmem:[%s1243_s0 + $0x36] sm:$0x1]   ;;  %v747_v11 = vld [vmem:[%s1243_s0 + $0x5] sm:$0x1]  }
  0x1d   :  { %s888_s20 = smov 44   ;;  %v748_v12 = vld [vmem:[%s1243_s0 + $0x14] sm:$0x1]   ;;  %v749_v13 = vld [vmem:[%s1243_s0 + $0x23] sm:$0x1]   ;;  %s896_s15 = smov 28  }
  0x1e   :  { %v750_v14 = vld [vmem:[%s1243_s0 + $0x32] sm:$0x1]   ;;  %v751_v15 = vld [vmem:[%s1243_s0 + $0x1] sm:$0x1]   ;;  %v752_v16 = vld [vmem:[%s1243_s0 + $0x10] sm:$0x1]  }
  0x1f   :  { %v753_v17 = vld [vmem:[%s1243_s0 + $0x1f] sm:$0x1]   ;;  %v754_v18 = vld [vmem:[%s1243_s0 + $0x2e] sm:$0x1]   ;;  %v755_v19 = vld [vmem:[%s1243_s0 + $0x3d] sm:$0x1]  }
  0x20   :  { %206 = vrot.lane.b32.xlu0 %v205_v46, %s861_s26  ;;  %220 = vrot.lane.b32.xlu1 %v219_v47, %s862_s27  ;;  %s890_s26 = smov 40   ;;  %v756_v20 = vld [vmem:[%s1243_s0 + $0xc] sm:$0x1]   ;;  %s898_s21 = smov 24   ;;  %v757_v21 = vld [vmem:[%s1243_s0 + $0x1b] sm:$0x1]  }
  0x21   :  { %v758_v22 = vld [vmem:[%s1243_s0 + $0x2a] sm:$0x1]   ;;  %s900_s27 = smov 20   ;;  %v759_v23 = vld [vmem:[%s1243_s0 + $0x39] sm:$0x1]   ;;  %vm16_vm0 = vcmask 1048560  }
  0x22   :  { %v760_v24 = vld [vmem:[%s1243_s0 + $0x8] sm:$0x1]   ;;  %v761_v25 = vld [vmem:[%s1243_s0 + $0x17] sm:$0x1]   ;;  %v762_v26 = vld [vmem:[%s1243_s0 + $0x26] sm:$0x1]  }
  0x23   :  { %v763_v27 = vld [vmem:[%s1243_s0 + $0x35] sm:$0x1]   ;;  %vm44_vm2 = vcmask 1048528   ;;  %v764_v29 = vld [vmem:[%s1243_s0 + $0x4] sm:$0x1]   ;;  %s906_s16 = smov 8  }
  0x24   :  { %230 = vrot.lane.b32.xlu0 %v721_v48, %s863_s3  ;;  %237 = vrot.lane.b32.xlu1 %v722_v49, %s864_s4  ;;  %s892_s3 = smov 36   ;;  %s902_s4 = smov 16   ;;  %v765_v31 = vld [vmem:[%s1243_s0 + $0x13] sm:$0x1]   ;;  %v766_v33 = vld [vmem:[%s1243_s0 + $0x22] sm:$0x1]  }
  0x25   :  { %s908_s22 = smov 4   ;;  %v767_v35 = vld [vmem:[%s1243_s0 + $0x31] sm:$0x1]   ;;  %s909_s0 = smov 2  }
  0x28   :  { %244 = vrot.lane.b32.xlu0 %v723_v50, %s865_s9  ;;  %251 = vrot.lane.b32.xlu1 %v724_v51, %s866_s10  ;;  %s894_s9 = smov 32   ;;  %s904_s10 = smov 12  }
  0x2c   :  { %258 = vrot.lane.b32.xlu0 %v725_v52, %s867_s17  ;;  %265 = vrot.lane.b32.xlu1 %v726_v53, %s868_s18  ;;  %s877_s18 = smov 66  }
  0x30   :  { %272 = vrot.lane.b32.xlu0 %v727_v55, %s869_s23  ;;  %279 = vrot.lane.b32.xlu1 %v728_v56, %s870_s24  ;;  %s879_s24 = smov 62  }
  0x34   :  { %286 = vrot.lane.b32.xlu0 %v729_v57, %s871_s29  ;;  %293 = vrot.lane.b32.xlu1 %v730_v58, %s872_s30  ;;  %s881_s30 = smov 58  }
  0x38   :  { %300 = vrot.lane.b32.xlu0 %v731_v59, %s873_s6  ;;  %307 = vrot.lane.b32.xlu1 %v732_v60, %s874_s7  ;;  %s883_s7 = smov 54  }
  0x3c   :  { %314 = vrot.lane.b32.xlu0 %v733_v61, %s875_s12  ;;  %321 = vrot.lane.b32.xlu1 %v734_v62, %s876_s13  ;;  %s885_s13 = smov 50  }
  0x40   :  { %327 = vrot.lane.b32.xlu0 %v735_v63, %s877_s18  ;;  %334 = vrot.lane.b32.xlu1 %v736_v0, %s878_s19  ;;  %s887_s19 = smov 46  }
  0x44   :  { %341 = vrot.lane.b32.xlu0 %v737_v1, %s879_s24  ;;  %348 = vrot.lane.b32.xlu1 %v738_v2, %s880_s25  ;;  %s889_s25 = smov 42  }
  0x48   :  { %355 = vrot.lane.b32.xlu0 %v739_v3, %s881_s30  ;;  %362 = vrot.lane.b32.xlu1 %v740_v4, %s882_s2  ;;  %s891_s2 = smov 38  }
  0x4c   :  { %369 = vrot.lane.b32.xlu0 %v741_v5, %s883_s7  ;;  %376 = vrot.lane.b32.xlu1 %v742_v6, %s884_s8  ;;  %s893_s8 = smov 34  }
  0x50   :  { %383 = vrot.lane.b32.xlu0 %v743_v7, %s885_s13  ;;  %390 = vrot.lane.b32.xlu1 %v744_v8, %s886_s14  ;;  %s895_s14 = smov 30  }
  0x54   :  { %397 = vrot.lane.b32.xlu0 %v745_v9, %s887_s19  ;;  %404 = vrot.lane.b32.xlu1 %v746_v10, %s888_s20  ;;  %s897_s20 = smov 26  }
  0x58   :  { %411 = vrot.lane.b32.xlu0 %v747_v11, %s889_s25  ;;  %418 = vrot.lane.b32.xlu1 %v748_v12, %s890_s26  ;;  %s899_s26 = smov 22  }
  0x5c   :  { %425 = vrot.lane.b32.xlu0 %v749_v13, %s891_s2  ;;  %432 = vrot.lane.b32.xlu1 %v750_v14, %s892_s3  ;;  %s901_s3 = smov 18  }
  0x60   :  { %439 = vrot.lane.b32.xlu0 %v751_v15, %s893_s8  ;;  %445 = vrot.lane.b32.xlu1 %v752_v16, %s894_s9  ;;  %s903_s9 = smov 14  }
  0x64   :  { %452 = vrot.lane.b32.xlu0 %v753_v17, %s895_s14  ;;  %459 = vrot.lane.b32.xlu1 %v754_v18, %s896_s15  ;;  %s905_s15 = smov 10  }
  0x68   :  { %466 = vrot.lane.b32.xlu0 %v755_v19, %s897_s20  ;;  %473 = vrot.lane.b32.xlu1 %v756_v20, %s898_s21  ;;  %s907_s21 = smov 6  }
  0x6c   :  { %480 = vrot.lane.b32.xlu0 %v757_v21, %s899_s26  ;;  %487 = vrot.lane.b32.xlu1 %v758_v22, %s900_s27 }
  0x70   :  { %494 = vrot.lane.b32.xlu0 %v759_v23, %s901_s3  ;;  %501 = vrot.lane.b32.xlu1 %v760_v24, %s902_s4 }
  0x74   :  { %508 = vrot.lane.b32.xlu0 %v761_v25, %s903_s9  ;;  %515 = vrot.lane.b32.xlu1 %v762_v26, %s904_s10 }
  0x76   :  { %v12_v28 = vpop.permute.xlu0 %11   ;;  %v40_v30 = vpop.permute.xlu1 %39  }
  0x77   :  { %15 = vst.msk [vmem:[#allocation0 + $0x20] sm:$0x1] %vm13_vm15, %v12_v28   ;;  %vm1247_vm15 = vcmask 31744  }
  0x78   :  { %18 = vst.msk [vmem:[#allocation0 + $0x18] sm:$0x1] %vm16_vm0, %v12_v28   ;;  %522 = vrot.lane.b32.xlu0 %v763_v27, %s905_s15  ;;  %529 = vrot.lane.b32.xlu1 %v764_v29, %s906_s16  ;;  %vm1248_vm0 = vcmask 15360  }
  0x79   :  { %43 = vst.msk [vmem:[#allocation0 + $0x60] sm:$0x1] %vm41_vm13, %v40_v30   ;;  %vm58_vm13 = vcmask 1048512  }
  0x7a   :  { %46 = vst.msk [vmem:[#allocation0 + $0x58] sm:$0x1] %vm44_vm2, %v40_v30   ;;  %vm30_vm2 = vcmask 1048544   ;;  %v26_v32 = vpop.permute.xlu0 %25   ;;  %v54_v34 = vpop.permute.xlu1 %53  }
  0x7b   :  { %29 = vst.msk [vmem:[#allocation0 + $0x40] sm:$0x1] %vm27_vm14, %v26_v32   ;;  %vm86_vm14 = vcmask 1048480  }
  0x7c   :  { %32 = vst.msk [vmem:[#allocation0 + $0x38] sm:$0x1] %vm30_vm2, %v26_v32   ;;  %536 = vrot.lane.b32.xlu0 %v765_v31, %s907_s21  ;;  %543 = vrot.lane.b32.xlu1 %v766_v33, %s908_s22  ;;  %vm232_vm2 = vcmask 1048304  }
  0x7d   :  { %57 = vst.msk [vmem:[#allocation0 + $0x80] sm:$0x1] %vm55_vm12, %v54_v34   ;;  %vm72_vm12 = vcmask 1048496  }
  0x7e   :  { %60 = vst.msk [vmem:[#allocation0 + $0x78] sm:$0x1] %vm58_vm13, %v54_v34   ;;  %v68_v36 = vpop.permute.xlu0 %67   ;;  %v82_v37 = vpop.permute.xlu1 %81   ;;  %vm239_vm13 = vcmask 1031904  }
  0x7f   :  { %71 = vst.msk [vmem:[#allocation0 + $0x18] sm:$0x1] %vm69_vm11, %v68_v36   ;;  %vm114_vm11 = vcmask 1048448  }
  0x80   :  { %74 = vst.msk [vmem:[#allocation0 + $0x10] sm:$0x1] %vm72_vm12, %v68_v36   ;;  %550 = vrot.lane.b32.xlu0 %v767_v35, %s909_s0  ;;  %vm246_vm12 = vcmask 1015504  }
  0x81   :  { %85 = vst.msk [vmem:[#allocation0 + $0x38] sm:$0x1] %vm83_vm10, %v82_v37   ;;  %vm100_vm10 = vcmask 1048464  }
  0x82   :  { %88 = vst.msk [vmem:[#allocation0 + $0x30] sm:$0x1] %vm86_vm14, %v82_v37   ;;  %v96_v38 = vpop.permute.xlu0 %95   ;;  %v110_v39 = vpop.permute.xlu1 %109   ;;  %vm253_vm14 = vcmask 999104  }
  0x83   :  { %99 = vst.msk [vmem:[#allocation0 + $0x58] sm:$0x1] %vm97_vm9, %v96_v38   ;;  %vm142_vm9 = vcmask 1048416  }
  0x84   :  { %102 = vst.msk [vmem:[#allocation0 + $0x50] sm:$0x1] %vm100_vm10, %v96_v38   ;;  %vm260_vm10 = vcmask 982704  }
  0x85   :  { %113 = vst.msk [vmem:[#allocation0 + $0x78] sm:$0x1] %vm111_vm8, %v110_v39   ;;  %vm128_vm8 = vcmask 1048432  }
  0x86   :  { %116 = vst.msk [vmem:[#allocation0 + $0x70] sm:$0x1] %vm114_vm11, %v110_v39   ;;  %v124_v40 = vpop.permute.xlu0 %123   ;;  %v138_v41 = vpop.permute.xlu1 %137   ;;  %vm267_vm11 = vcmask 966304  }
  0x87   :  { %127 = vst.msk [vmem:[#allocation0 + $0x10] sm:$0x1] %vm107_vm7, %v124_v40   ;;  %vm170_vm7 = vcmask 1048384  }
  0x88   :  { %130 = vst.msk [vmem:[#allocation0 + $0x8] sm:$0x1] %vm128_vm8, %v124_v40   ;;  %vm274_vm8 = vcmask 949904  }
  0x89   :  { %141 = vst.msk [vmem:[#allocation0 + $0x30] sm:$0x1] %vm93_vm6, %v138_v41   ;;  %vm156_vm6 = vcmask 1048400  }
  0x8a   :  { %144 = vst.msk [vmem:[#allocation0 + $0x28] sm:$0x1] %vm142_vm9, %v138_v41   ;;  %v152_v42 = vpop.permute.xlu0 %151   ;;  %v166_v43 = vpop.permute.xlu1 %165   ;;  %vm281_vm9 = vcmask 933504  }
  0x8b   :  { %155 = vst.msk [vmem:[#allocation0 + $0x50] sm:$0x1] %vm79_vm5, %v152_v42   ;;  %vm197_vm5 = vcmask 1048352  }
  0x8c   :  { %158 = vst.msk [vmem:[#allocation0 + $0x48] sm:$0x1] %vm156_vm6, %v152_v42   ;;  %vm288_vm6 = vcmask 917104  }
  0x8d   :  { %169 = vst.msk [vmem:[#allocation0 + $0x70] sm:$0x1] %vm65_vm4, %v166_v43   ;;  %vm184_vm4 = vcmask 1048368  }
  0x8e   :  { %172 = vst.msk [vmem:[#allocation0 + $0x68] sm:$0x1] %vm170_vm7, %v166_v43   ;;  %v180_v44 = vpop.permute.xlu0 %179   ;;  %v193_v45 = vpop.permute.xlu1 %192   ;;  %vm295_vm7 = vcmask 900704  }
  0x8f   :  { %183 = vst.msk [vmem:[#allocation0 + $0x8] sm:$0x1] %vm51_vm3, %v180_v44   ;;  %vm225_vm3 = vcmask 1048320  }
  0x90   :  { %185 = vst.msk [vmem:[#allocation0] sm:$0x1] %vm184_vm4, %v180_v44   ;;  %vm302_vm4 = vcmask 884304  }
  0x91   :  { %196 = vst.msk [vmem:[#allocation0 + $0x28] sm:$0x1] %vm37_vm1, %v193_v45   ;;  %vm211_vm1 = vcmask 1048336  }
  0x92   :  { %199 = vst.msk [vmem:[#allocation0 + $0x20] sm:$0x1] %vm197_vm5, %v193_v45   ;;  %v207_v46 = vpop.permute.xlu0 %206   ;;  %v221_v47 = vpop.permute.xlu1 %220   ;;  %vm309_vm5 = vcmask 867904  }
  0x93   :  { %210 = vst.msk [vmem:[#allocation0 + $0x48] sm:$0x1] %vm1247_vm15, %v207_v46   ;;  %vm329_vm15 = vcmask 818704  }
  0x94   :  { %213 = vst.msk [vmem:[#allocation0 + $0x40] sm:$0x1] %vm211_vm1, %v207_v46   ;;  %vm316_vm1 = vcmask 851504  }
  0x95   :  { %224 = vst.msk [vmem:[#allocation0 + $0x68] sm:$0x1] %vm1248_vm0, %v221_v47   ;;  %vm336_vm0 = vcmask 802304  }
  0x96   :  { %227 = vst.msk [vmem:[#allocation0 + $0x60] sm:$0x1] %vm225_vm3, %v221_v47   ;;  %v231_v48 = vpop.permute.xlu0 %230   ;;  %v238_v49 = vpop.permute.xlu1 %237   ;;  %vm323_vm3 = vcmask 835104  }
  0x97   :  { %234 = vst.msk [vmem:[#allocation0 + $0x80] sm:$0x1] %vm232_vm2, %v231_v48   ;;  %vm343_vm2 = vcmask 785904  }
  0x98   :  { %241 = vst.msk [vmem:[#allocation0 + $0x18] sm:$0x1] %vm239_vm13, %v238_v49   ;;  %vm350_vm13 = vcmask 769504  }
  0x9a   :  { %v245_v50 = vpop.permute.xlu0 %244   ;;  %v252_v51 = vpop.permute.xlu1 %251  }
  0x9b   :  { %248 = vst.msk [vmem:[#allocation0 + $0x38] sm:$0x1] %vm246_vm12, %v245_v50   ;;  %vm357_vm12 = vcmask 753104  }
  0x9c   :  { %255 = vst.msk [vmem:[#allocation0 + $0x58] sm:$0x1] %vm253_vm14, %v252_v51   ;;  %vm364_vm14 = vcmask 736704  }
  0x9e   :  { %v259_v52 = vpop.permute.xlu0 %258   ;;  %v266_v53 = vpop.permute.xlu1 %265  }
  0x9f   :  { %262 = vst.msk [vmem:[#allocation0 + $0x78] sm:$0x1] %vm260_vm10, %v259_v52   ;;  %vm371_vm10 = vcmask 720304  }
  0xa0   :  { %269 = vst.msk [vmem:[#allocation0 + $0x10] sm:$0x1] %vm267_vm11, %v266_v53   ;;  %vm378_vm11 = vcmask 703904  }
  0xa2   :  { %v273_v54 = vpop.permute.xlu0 %272   ;;  %v280_v55 = vpop.permute.xlu1 %279  }
  0xa3   :  { %276 = vst.msk [vmem:[#allocation0 + $0x30] sm:$0x1] %vm274_vm8, %v273_v54   ;;  %vm385_vm8 = vcmask 687504  }
  0xa4   :  { %283 = vst.msk [vmem:[#allocation0 + $0x50] sm:$0x1] %vm281_vm9, %v280_v55   ;;  %vm392_vm9 = vcmask 671104  }
  0xa6   :  { %v287_v56 = vpop.permute.xlu0 %286   ;;  %v294_v57 = vpop.permute.xlu1 %293  }
  0xa7   :  { %290 = vst.msk [vmem:[#allocation0 + $0x70] sm:$0x1] %vm288_vm6, %v287_v56   ;;  %vm399_vm6 = vcmask 654704  }
  0xa8   :  { %297 = vst.msk [vmem:[#allocation0 + $0x8] sm:$0x1] %vm295_vm7, %v294_v57   ;;  %vm406_vm7 = vcmask 638304  }
  0xaa   :  { %v301_v58 = vpop.permute.xlu0 %300   ;;  %v308_v59 = vpop.permute.xlu1 %307  }
  0xab   :  { %304 = vst.msk [vmem:[#allocation0 + $0x28] sm:$0x1] %vm302_vm4, %v301_v58   ;;  %vm413_vm4 = vcmask 621904  }
  0xac   :  { %311 = vst.msk [vmem:[#allocation0 + $0x48] sm:$0x1] %vm309_vm5, %v308_v59   ;;  %vm420_vm5 = vcmask 605504  }
  0xae   :  { %v315_v60 = vpop.permute.xlu0 %314   ;;  %v322_v61 = vpop.permute.xlu1 %321  }
  0xaf   :  { %318 = vst.msk [vmem:[#allocation0 + $0x68] sm:$0x1] %vm316_vm1, %v315_v60   ;;  %vm427_vm1 = vcmask 589104  }
  0xb0   :  { %324 = vst.msk [vmem:[#allocation0] sm:$0x1] %vm323_vm3, %v322_v61   ;;  %vm434_vm3 = vcmask 572704  }
  0xb2   :  { %v328_v62 = vpop.permute.xlu0 %327   ;;  %v335_v63 = vpop.permute.xlu1 %334  }
  0xb3   :  { %331 = vst.msk [vmem:[#allocation0 + $0x20] sm:$0x1] %vm329_vm15, %v328_v62   ;;  %vm441_vm15 = vcmask 556304  }
  0xb4   :  { %338 = vst.msk [vmem:[#allocation0 + $0x40] sm:$0x1] %vm336_vm0, %v335_v63   ;;  %vm447_vm0 = vcmask 539904  }
  0xb6   :  { %v342_v0 = vpop.permute.xlu0 %341   ;;  %v349_v1 = vpop.permute.xlu1 %348  }
  0xb7   :  { %345 = vst.msk [vmem:[#allocation0 + $0x60] sm:$0x1] %vm343_vm2, %v342_v0   ;;  %vm454_vm2 = vcmask 523504  }
  0xb8   :  { %352 = vst.msk [vmem:[#allocation0 + $0x80] sm:$0x1] %vm350_vm13, %v349_v1   ;;  %vm461_vm13 = vcmask 507104  }
  0xba   :  { %v356_v2 = vpop.permute.xlu0 %355   ;;  %v363_v3 = vpop.permute.xlu1 %362  }
  0xbb   :  { %359 = vst.msk [vmem:[#allocation0 + $0x18] sm:$0x1] %vm357_vm12, %v356_v2   ;;  %vm468_vm12 = vcmask 490704  }
  0xbc   :  { %366 = vst.msk [vmem:[#allocation0 + $0x38] sm:$0x1] %vm364_vm14, %v363_v3   ;;  %vm475_vm14 = vcmask 474304  }
  0xbe   :  { %v370_v4 = vpop.permute.xlu0 %369   ;;  %v377_v5 = vpop.permute.xlu1 %376  }
  0xbf   :  { %373 = vst.msk [vmem:[#allocation0 + $0x58] sm:$0x1] %vm371_vm10, %v370_v4   ;;  %vm482_vm10 = vcmask 457904  }
  0xc0   :  { %380 = vst.msk [vmem:[#allocation0 + $0x78] sm:$0x1] %vm378_vm11, %v377_v5   ;;  %vm489_vm11 = vcmask 441504  }
  0xc2   :  { %v384_v6 = vpop.permute.xlu0 %383   ;;  %v391_v7 = vpop.permute.xlu1 %390  }
  0xc3   :  { %387 = vst.msk [vmem:[#allocation0 + $0x10] sm:$0x1] %vm385_vm8, %v384_v6   ;;  %vm496_vm8 = vcmask 425104  }
  0xc4   :  { %394 = vst.msk [vmem:[#allocation0 + $0x30] sm:$0x1] %vm392_vm9, %v391_v7   ;;  %vm503_vm9 = vcmask 408704  }
  0xc6   :  { %v398_v8 = vpop.permute.xlu0 %397   ;;  %v405_v9 = vpop.permute.xlu1 %404  }
  0xc7   :  { %401 = vst.msk [vmem:[#allocation0 + $0x50] sm:$0x1] %vm399_vm6, %v398_v8   ;;  %vm510_vm6 = vcmask 392304  }
  0xc8   :  { %408 = vst.msk [vmem:[#allocation0 + $0x70] sm:$0x1] %vm406_vm7, %v405_v9   ;;  %vm517_vm7 = vcmask 375904  }
  0xca   :  { %v412_v10 = vpop.permute.xlu0 %411   ;;  %v419_v11 = vpop.permute.xlu1 %418  }
  0xcb   :  { %415 = vst.msk [vmem:[#allocation0 + $0x8] sm:$0x1] %vm413_vm4, %v412_v10   ;;  %vm524_vm4 = vcmask 359504  }
  0xcc   :  { %422 = vst.msk [vmem:[#allocation0 + $0x28] sm:$0x1] %vm420_vm5, %v419_v11   ;;  %vm531_vm5 = vcmask 343104  }
  0xce   :  { %v426_v12 = vpop.permute.xlu0 %425   ;;  %v433_v13 = vpop.permute.xlu1 %432  }
  0xcf   :  { %429 = vst.msk [vmem:[#allocation0 + $0x48] sm:$0x1] %vm427_vm1, %v426_v12   ;;  %vm538_vm1 = vcmask 326704  }
  0xd0   :  { %436 = vst.msk [vmem:[#allocation0 + $0x68] sm:$0x1] %vm434_vm3, %v433_v13   ;;  %vm545_vm3 = vcmask 310304  }
  0xd2   :  { %v440_v14 = vpop.permute.xlu0 %439   ;;  %v446_v15 = vpop.permute.xlu1 %445  }
  0xd3   :  { %442 = vst.msk [vmem:[#allocation0] sm:$0x1] %vm441_vm15, %v440_v14   ;;  %vm552_vm15 = vcmask 293904  }
  0xd4   :  { %449 = vst.msk [vmem:[#allocation0 + $0x20] sm:$0x1] %vm447_vm0, %v446_v15  }
  0xd6   :  { %v453_v16 = vpop.permute.xlu0 %452   ;;  %v460_v17 = vpop.permute.xlu1 %459  }
  0xd7   :  { %456 = vst.msk [vmem:[#allocation0 + $0x40] sm:$0x1] %vm454_vm2, %v453_v16  }
  0xd8   :  { %463 = vst.msk [vmem:[#allocation0 + $0x60] sm:$0x1] %vm461_vm13, %v460_v17  }
  0xda   :  { %v559_v18 = vld [vmem:[#allocation0] sm:$0x1]  ;;  %v467_v19 = vpop.permute.xlu0 %466   ;;  %v474_v21 = vpop.permute.xlu1 %473  }
  0xdb   :  { %562 = vst [vmem:[%s1244_s1] sm:$0x1] %v559_v18  ;;  %v584_v20 = vld [vmem:[#allocation0 + $0x20] sm:$0x1]  ;;  %470 = vst.msk [vmem:[#allocation0 + $0x80] sm:$0x1] %vm468_vm12, %v467_v19  }
  0xdc   :  { %771 = vst [vmem:[%s1244_s1 + $0x4] sm:$0x1] %v584_v20  ;;  %477 = vst.msk [vmem:[#allocation0 + $0x18] sm:$0x1] %vm475_vm14, %v474_v21  }
  0xde   :  { %v612_v22 = vld [vmem:[#allocation0 + $0x40] sm:$0x1]  ;;  %v481_v23 = vpop.permute.xlu0 %480   ;;  %v488_v25 = vpop.permute.xlu1 %487  }
  0xdf   :  { %775 = vst [vmem:[%s1244_s1 + $0x8] sm:$0x1] %v612_v22  ;;  %v640_v24 = vld [vmem:[#allocation0 + $0x60] sm:$0x1]  ;;  %484 = vst.msk [vmem:[#allocation0 + $0x38] sm:$0x1] %vm482_vm10, %v481_v23  }
  0xe0   :  { %779 = vst [vmem:[%s1244_s1 + $0xc] sm:$0x1] %v640_v24  ;;  %491 = vst.msk [vmem:[#allocation0 + $0x58] sm:$0x1] %vm489_vm11, %v488_v25  }
  0xe2   :  { %v668_v26 = vld [vmem:[#allocation0 + $0x80] sm:$0x1]  ;;  %v495_v27 = vpop.permute.xlu0 %494   ;;  %v502_v29 = vpop.permute.xlu1 %501  }
  0xe3   :  { %783 = vst [vmem:[%s1244_s1 + $0x10] sm:$0x1] %v668_v26  ;;  %v577_v28 = vld [vmem:[#allocation0 + $0x18] sm:$0x1]  ;;  %498 = vst.msk [vmem:[#allocation0 + $0x78] sm:$0x1] %vm496_vm8, %v495_v27  }
  0xe4   :  { %770 = vst [vmem:[%s1244_s1 + $0x3] sm:$0x1] %v577_v28  ;;  %505 = vst.msk [vmem:[#allocation0 + $0x10] sm:$0x1] %vm503_vm9, %v502_v29  }
  0xe6   :  { %v605_v30 = vld [vmem:[#allocation0 + $0x38] sm:$0x1]  ;;  %v509_v31 = vpop.permute.xlu0 %508   ;;  %v516_v33 = vpop.permute.xlu1 %515  }
  0xe7   :  { %774 = vst [vmem:[%s1244_s1 + $0x7] sm:$0x1] %v605_v30  ;;  %v633_v32 = vld [vmem:[#allocation0 + $0x58] sm:$0x1]  ;;  %512 = vst.msk [vmem:[#allocation0 + $0x30] sm:$0x1] %vm510_vm6, %v509_v31  }
  0xe8   :  { %778 = vst [vmem:[%s1244_s1 + $0xb] sm:$0x1] %v633_v32  ;;  %519 = vst.msk [vmem:[#allocation0 + $0x50] sm:$0x1] %vm517_vm7, %v516_v33  }
  0xea   :  { %v661_v34 = vld [vmem:[#allocation0 + $0x78] sm:$0x1]  ;;  %v523_v35 = vpop.permute.xlu0 %522   ;;  %v530_v37 = vpop.permute.xlu1 %529  }
  0xeb   :  { %782 = vst [vmem:[%s1244_s1 + $0xf] sm:$0x1] %v661_v34  ;;  %v570_v36 = vld [vmem:[#allocation0 + $0x10] sm:$0x1]  ;;  %526 = vst.msk [vmem:[#allocation0 + $0x70] sm:$0x1] %vm524_vm4, %v523_v35  }
  0xec   :  { %769 = vst [vmem:[%s1244_s1 + $0x2] sm:$0x1] %v570_v36  ;;  %533 = vst.msk [vmem:[#allocation0 + $0x8] sm:$0x1] %vm531_vm5, %v530_v37  }
  0xee   :  { %v598_v38 = vld [vmem:[#allocation0 + $0x30] sm:$0x1]  ;;  %v537_v39 = vpop.permute.xlu0 %536   ;;  %v544_v41 = vpop.permute.xlu1 %543  }
  0xef   :  { %773 = vst [vmem:[%s1244_s1 + $0x6] sm:$0x1] %v598_v38  ;;  %v626_v40 = vld [vmem:[#allocation0 + $0x50] sm:$0x1]  ;;  %540 = vst.msk [vmem:[#allocation0 + $0x28] sm:$0x1] %vm538_vm1, %v537_v39  }
  0xf0   :  { %777 = vst [vmem:[%s1244_s1 + $0xa] sm:$0x1] %v626_v40  ;;  %547 = vst.msk [vmem:[#allocation0 + $0x48] sm:$0x1] %vm545_vm3, %v544_v41  }
  0xf2   :  { %v654_v42 = vld [vmem:[#allocation0 + $0x70] sm:$0x1]  ;;  %v551_v43 = vpop.permute.xlu0 %550  }
  0xf3   :  { %781 = vst [vmem:[%s1244_s1 + $0xe] sm:$0x1] %v654_v42  ;;  %v564_v44 = vld [vmem:[#allocation0 + $0x8] sm:$0x1]  ;;  %554 = vst.msk [vmem:[#allocation0 + $0x68] sm:$0x1] %vm552_vm15, %v551_v43  }
  0xf4   :  { %768 = vst [vmem:[%s1244_s1 + $0x1] sm:$0x1] %v564_v44 }
  0xf6   :  { %v591_v45 = vld [vmem:[#allocation0 + $0x28] sm:$0x1] }
  0xf7   :  { %772 = vst [vmem:[%s1244_s1 + $0x5] sm:$0x1] %v591_v45  ;;  %v619_v46 = vld [vmem:[#allocation0 + $0x48] sm:$0x1] }
  0xf8   :  { %776 = vst [vmem:[%s1244_s1 + $0x9] sm:$0x1] %v619_v46 }
  0xfa   :  { %v647_v47 = vld [vmem:[#allocation0 + $0x68] sm:$0x1] }
  0xfb   :  { %780 = vst [vmem:[%s1244_s1 + $0xd] sm:$0x1] %v647_v47 }

// kernel: _scale_var_pallas.1
= control target key start
LH: loop header
LB: loop body
LE: loop exit
PB: predicated region body
PF: predicated region fallthrough
CT: control target
= control target key end

     0   :  { %v57_v0 = vlaneseq  ;;  %s762_s1 = inlined_call_operand.vmem [shape: f32[1,2176], index: 1, kind: input, shape index: {}]   ;;  %s763_s2 = inlined_call_operand.vmem [shape: f32[1,2176], index: 2, kind: input, shape index: {}]   ;;  %s764_s0 = inlined_call_operand.vmem [shape: f32[16,2176], index: 0, kind: input, shape index: {}]   ;;  %s765_s3 = inlined_call_operand.vmem [shape: f32[16,2176], index: 3, kind: output, shape index: {}]  }
   0x1   :  { %v48_v2 = vld [vmem:[%s762_s1] sm:$0xff]  ;;  %v15_v9 = vld [vmem:[%s764_s0 + $0x8] sm:$0xff]  ;;  %v16_v18 = vld [vmem:[%s764_s0 + $0x10] sm:$0xff] }
   0x2   :  { %v58_v1 = vshrl.u32 %v57_v0, 7  ;;  %v51_v3 = vld [vmem:[%s763_s2] sm:$0xff]  ;;  %v17_v19 = vld [vmem:[%s764_s0 + $0x18] sm:$0xff]  ;;  %v19_v29 = vld [vmem:[%s764_s0 + $0x28] sm:$0xff] }
   0x3   :  { %v14_v8 = vld [vmem:[%s764_s0] sm:$0xff]  ;;  %v20_v34 = vld [vmem:[%s764_s0 + $0x30] sm:$0xff]  ;;  %v49_v39 = vld [vmem:[%s762_s1 + $0x8] sm:$0xff] }
   0x4   :  { %v59_v4 = vsub.s32 0, %v58_v1  ;;  %v63_v5 = vsub.s32 1, %v58_v1  ;;  %v364_v6 = vsub.s32 2, %v58_v1  ;;  %v366_v7 = vsub.s32 3, %v58_v1  ;;  %v18_v24 = vld [vmem:[%s764_s0 + $0x20] sm:$0xff]  ;;  %v445_v40 = vld [vmem:[%s763_s2 + $0x8] sm:$0xff] }
   0x5   :  { %v374_v10 = vsub.s32 4, %v58_v1  ;;  %v376_v11 = vsub.s32 5, %v58_v1  ;;  %v378_v12 = vsub.s32 6, %v58_v1  ;;  %v380_v13 = vsub.s32 7, %v58_v1  ;;  %v21_v45 = vld [vmem:[%s764_s0 + $0x38] sm:$0xff]  ;;  %v22_v50 = vld [vmem:[%s764_s0 + $0x40] sm:$0xff] }
   0x6   :  { %v382_v14 = vrot.slane %v48_v2, %v59_v4  ;;  %v384_v15 = vrot.slane %v51_v3, %v59_v4  ;;  %v386_v16 = vrot.slane %v48_v2, %v63_v5  ;;  %v388_v17 = vrot.slane %v51_v3, %v63_v5  ;;  %v23_v51 = vld [vmem:[%s764_s0 + $0x48] sm:$0xff]  ;;  %v24_v56 = vld [vmem:[%s764_s0 + $0x50] sm:$0xff]  ;;  %v25_v61 = vld [vmem:[%s764_s0 + $0x58] sm:$0xff] }
   0x7   :  { %v397_v20 = vrot.slane %v48_v2, %v364_v6  ;;  %v400_v21 = vrot.slane %v51_v3, %v364_v6  ;;  %v403_v22 = vrot.slane %v48_v2, %v366_v7  ;;  %v406_v23 = vrot.slane %v51_v3, %v366_v7 }
   0x8   :  { %v142_v25 = vsub.f32 %v14_v8, %v382_v14  ;;  %v143_v26 = vsub.f32 %v15_v9, %v386_v16  ;;  %v414_v27 = vrot.slane %v48_v2, %v374_v10  ;;  %v417_v28 = vrot.slane %v51_v3, %v374_v10  ;;  %v27_v8 = vld [vmem:[%s764_s0 + $0x68] sm:$0xff] }
   0x9   :  { %v144_v30 = vsub.f32 %v16_v18, %v397_v20  ;;  %v145_v31 = vsub.f32 %v17_v19, %v403_v22  ;;  %v425_v32 = vrot.slane %v48_v2, %v376_v11  ;;  %v428_v33 = vrot.slane %v51_v3, %v376_v11 }
   0xa   :  { %v264_v35 = vmul.f32 %v384_v15, %v142_v25  ;;  %v265_v36 = vmul.f32 %v388_v17, %v143_v26  ;;  %v146_v37 = vsub.f32 %v18_v24, %v414_v27  ;;  %v437_v38 = vrot.slane %v48_v2, %v378_v12  ;;  %v30_v25 = vld [vmem:[%s764_s0 + $0x80] sm:$0xff]  ;;  %v553_v26 = vld [vmem:[%s762_s1 + $0x10] ss:$0 sm:$0xff] }
   0xb   :  { %v266_v41 = vmul.f32 %v400_v21, %v144_v30  ;;  %v267_v42 = vmul.f32 %v406_v23, %v145_v31  ;;  %v147_v43 = vsub.f32 %v19_v29, %v425_v32  ;;  %v451_v44 = vrot.slane %v51_v3, %v378_v12 }
   0xc   :  { %298 = vst [vmem:[%s765_s3] sm:$0xff] %v264_v35  ;;  %299 = vst [vmem:[%s765_s3 + $0x8] sm:$0xff] %v265_v36  ;;  %v268_v46 = vmul.f32 %v417_v28, %v146_v37  ;;  %v148_v47 = vsub.f32 %v20_v34, %v437_v38  ;;  %v465_v48 = vrot.slane %v48_v2, %v380_v13  ;;  %v26_v2 = vld [vmem:[%s764_s0 + $0x60] sm:$0xff]  ;;  %v29_v34 = vld [vmem:[%s764_s0 + $0x78] sm:$0xff] }
   0xd   :  { %v468_v49 = vrot.slane %v51_v3, %v380_v13  ;;  %300 = vst [vmem:[%s765_s3 + $0x10] sm:$0xff] %v266_v41  ;;  %301 = vst [vmem:[%s765_s3 + $0x18] sm:$0xff] %v267_v42  ;;  %v269_v52 = vmul.f32 %v428_v33, %v147_v43  ;;  %v483_v53 = vrot.slane %v49_v39, %v59_v4  ;;  %v31_v35 = vld [vmem:[%s764_s0 + $0x88] sm:$0xff]  ;;  %v32_v36 = vld [vmem:[%s764_s0 + $0x90] sm:$0xff] }
   0xe   :  { %v486_v54 = vrot.slane %v445_v40, %v59_v4  ;;  %v488_v55 = vrot.slane %v49_v39, %v63_v5  ;;  %302 = vst [vmem:[%s765_s3 + $0x20] sm:$0xff] %v268_v46  ;;  %v270_v57 = vmul.f32 %v451_v44, %v148_v47  ;;  %v149_v58 = vsub.f32 %v21_v45, %v465_v48  ;;  %v596_v43 = vld [vmem:[%s763_s2 + $0x10] ss:$0 sm:$0xff]  ;;  %v33_v45 = vld [vmem:[%s764_s0 + $0x98] sm:$0xff]  ;;  %v34_v46 = vld [vmem:[%s764_s0 + $0xa0] sm:$0xff] }
   0xf   :  { %v499_v59 = vrot.slane %v445_v40, %v63_v5  ;;  %v502_v60 = vrot.slane %v49_v39, %v364_v6  ;;  %303 = vst [vmem:[%s765_s3 + $0x28] sm:$0xff] %v269_v52  ;;  %v150_v62 = vsub.f32 %v22_v50, %v483_v53  ;;  %v514_v0 = vrot.slane %v445_v40, %v364_v6 }
  0x10   :  { %v151_v63 = vsub.f32 %v23_v51, %v488_v55  ;;  %v517_v1 = vrot.slane %v49_v39, %v366_v7  ;;  %304 = vst [vmem:[%s765_s3 + $0x30] sm:$0xff] %v270_v57  ;;  %v271_v3 = vmul.f32 %v468_v49, %v149_v58  ;;  %v529_v5 = vrot.slane %v445_v40, %v366_v7  ;;  %v28_v7 = vld [vmem:[%s764_s0 + $0x70] sm:$0xff]  ;;  %v35_v58 = vld [vmem:[%s764_s0 + $0xa8] sm:$0xff] }
  0x11   :  { %v152_v4 = vsub.f32 %v24_v56, %v502_v60  ;;  %v532_v6 = vrot.slane %v49_v39, %v374_v10  ;;  %v272_v9 = vmul.f32 %v486_v54, %v150_v62  ;;  %v542_v24 = vrot.slane %v445_v40, %v374_v10 }
  0x12   :  { %v273_v18 = vmul.f32 %v499_v59, %v151_v63  ;;  %v153_v19 = vsub.f32 %v25_v61, %v517_v1  ;;  %305 = vst [vmem:[%s765_s3 + $0x38] sm:$0xff] %v271_v3  ;;  %v561_v30 = vrot.slane %v49_v39, %v376_v11  ;;  %v565_v31 = vrot.slane %v445_v40, %v376_v11  ;;  %v38_v63 = vld [vmem:[%s764_s0 + $0xc0] sm:$0xff]  ;;  %v40_v3 = vld [vmem:[%s764_s0 + $0xd0] sm:$0xff] }
  0x13   :  { %v274_v10 = vmul.f32 %v514_v0, %v152_v4  ;;  %v154_v29 = vsub.f32 %v26_v2, %v532_v6  ;;  %306 = vst [vmem:[%s765_s3 + $0x40] sm:$0xff] %v272_v9  ;;  %v584_v37 = vrot.slane %v49_v39, %v378_v12  ;;  %v588_v41 = vrot.slane %v445_v40, %v378_v12  ;;  %v39_v2 = vld [vmem:[%s764_s0 + $0xc8] sm:$0xff]  ;;  %v41_v9 = vld [vmem:[%s764_s0 + $0xd8] sm:$0xff] }
  0x14   :  { %307 = vst [vmem:[%s765_s3 + $0x48] sm:$0xff] %v273_v18  ;;  %v275_v11 = vmul.f32 %v529_v5, %v153_v19  ;;  %v591_v42 = vrot.slane %v49_v39, %v380_v13  ;;  %v155_v39 = vsub.f32 %v27_v8, %v561_v30  ;;  %v611_v47 = vrot.slane %v445_v40, %v380_v13  ;;  %v36_v13 = vld [vmem:[%s764_s0 + $0xb0] sm:$0xff]  ;;  %v37_v40 = vld [vmem:[%s764_s0 + $0xb8] sm:$0xff]  ;;  %v42_v18 = vld [vmem:[%s764_s0 + $0xe0] sm:$0xff] }
  0x15   :  { %308 = vst [vmem:[%s765_s3 + $0x50] sm:$0xff] %v274_v10  ;;  %v276_v12 = vmul.f32 %v542_v24, %v154_v29  ;;  %v158_v50 = vsub.f32 %v30_v25, %v553_v26  ;;  %v156_v51 = vsub.f32 %v28_v7, %v584_v37  ;;  %v159_v56 = vsub.f32 %v31_v35, %v382_v14  ;;  %v43_v25 = vld [vmem:[%s764_s0 + $0xe8] sm:$0xff]  ;;  %v44_v10 = vld [vmem:[%s764_s0 + $0xf0] sm:$0xff]  ;;  %v45_v29 = vld [vmem:[%s764_s0 + $0xf8] sm:$0xff] }
  0x16   :  { %309 = vst [vmem:[%s765_s3 + $0x58] sm:$0xff] %v275_v11  ;;  %v157_v52 = vsub.f32 %v29_v34, %v591_v42  ;;  %v160_v57 = vsub.f32 %v32_v36, %v386_v16  ;;  %v277_v14 = vmul.f32 %v565_v31, %v155_v39  ;;  %v161_v61 = vsub.f32 %v33_v45, %v397_v20  ;;  %v46_v34 = vld [vmem:[%s764_s0 + $0x100] sm:$0xff]  ;;  %v47_v35 = vld [vmem:[%s764_s0 + $0x108] sm:$0xff] }
  0x17   :  { %310 = vst [vmem:[%s765_s3 + $0x60] sm:$0xff] %v276_v12  ;;  %v280_v16 = vmul.f32 %v596_v43, %v158_v50  ;;  %v162_v62 = vsub.f32 %v34_v46, %v403_v22  ;;  %v278_v4 = vmul.f32 %v588_v41, %v156_v51  ;;  %v281_v20 = vmul.f32 %v384_v15, %v159_v56 }
  0x18   :  { %v279_v8 = vmul.f32 %v611_v47, %v157_v52  ;;  %v282_v22 = vmul.f32 %v388_v17, %v160_v57  ;;  %311 = vst [vmem:[%s765_s3 + $0x68] sm:$0xff] %v277_v14  ;;  %v283_v15 = vmul.f32 %v400_v21, %v161_v61  ;;  %v163_v19 = vsub.f32 %v35_v58, %v414_v27 }
  0x19   :  { %314 = vst [vmem:[%s765_s3 + $0x80] sm:$0xff] %v280_v16  ;;  %v284_v17 = vmul.f32 %v406_v23, %v162_v62  ;;  %v164_v7 = vsub.f32 %v36_v13, %v425_v32  ;;  %312 = vst [vmem:[%s765_s3 + $0x70] sm:$0xff] %v278_v4  ;;  %v165_v21 = vsub.f32 %v37_v40, %v437_v38 }
  0x1a   :  { %313 = vst [vmem:[%s765_s3 + $0x78] sm:$0xff] %v279_v8  ;;  %315 = vst [vmem:[%s765_s3 + $0x88] sm:$0xff] %v281_v20  ;;  %v166_v23 = vsub.f32 %v38_v63, %v465_v48  ;;  %v167_v27 = vsub.f32 %v39_v2, %v483_v53  ;;  %v168_v32 = vsub.f32 %v40_v3, %v488_v55 }
  0x1b   :  { %316 = vst [vmem:[%s765_s3 + $0x90] sm:$0xff] %v282_v22  ;;  %317 = vst [vmem:[%s765_s3 + $0x98] sm:$0xff] %v283_v15  ;;  %v285_v38 = vmul.f32 %v417_v28, %v163_v19  ;;  %v286_v48 = vmul.f32 %v428_v33, %v164_v7  ;;  %v169_v53 = vsub.f32 %v41_v9, %v502_v60 }
  0x1c   :  { %318 = vst [vmem:[%s765_s3 + $0xa0] sm:$0xff] %v284_v17  ;;  %v170_v55 = vsub.f32 %v42_v18, %v517_v1  ;;  %v287_v28 = vmul.f32 %v451_v44, %v165_v21  ;;  %v288_v33 = vmul.f32 %v468_v49, %v166_v23  ;;  %v289_v60 = vmul.f32 %v486_v54, %v167_v27 }
  0x1d   :  { %v290_v1 = vmul.f32 %v499_v59, %v168_v32  ;;  %319 = vst [vmem:[%s765_s3 + $0xa8] sm:$0xff] %v285_v38  ;;  %320 = vst [vmem:[%s765_s3 + $0xb0] sm:$0xff] %v286_v48  ;;  %v291_v36 = vmul.f32 %v514_v0, %v169_v53  ;;  %v171_v44 = vsub.f32 %v43_v25, %v532_v6 }
  0x1e   :  { %v292_v11 = vmul.f32 %v529_v5, %v170_v55  ;;  %v172_v49 = vsub.f32 %v44_v10, %v561_v30  ;;  %321 = vst [vmem:[%s765_s3 + $0xb8] sm:$0xff] %v287_v28  ;;  %322 = vst [vmem:[%s765_s3 + $0xc0] sm:$0xff] %v288_v33  ;;  %v173_v54 = vsub.f32 %v45_v29, %v584_v37 }
  0x1f   :  { %323 = vst [vmem:[%s765_s3 + $0xc8] sm:$0xff] %v289_v60  ;;  %324 = vst [vmem:[%s765_s3 + $0xd0] sm:$0xff] %v290_v1  ;;  %v174_v59 = vsub.f32 %v46_v34, %v591_v42  ;;  %v175_v0 = vsub.f32 %v47_v35, %v553_v26  ;;  %v293_v5 = vmul.f32 %v542_v24, %v171_v44 }
  0x20   :  { %325 = vst [vmem:[%s765_s3 + $0xd8] sm:$0xff] %v291_v36  ;;  %326 = vst [vmem:[%s765_s3 + $0xe0] sm:$0xff] %v292_v11  ;;  %v294_v6 = vmul.f32 %v565_v31, %v172_v49  ;;  %v295_v30 = vmul.f32 %v588_v41, %v173_v54 }
  0x21   :  { %v296_v37 = vmul.f32 %v611_v47, %v174_v59  ;;  %v297_v42 = vmul.f32 %v596_v43, %v175_v0  ;;  %327 = vst [vmem:[%s765_s3 + $0xe8] sm:$0xff] %v293_v5 }
  0x22   :  { %328 = vst [vmem:[%s765_s3 + $0xf0] sm:$0xff] %v294_v6  ;;  %329 = vst [vmem:[%s765_s3 + $0xf8] sm:$0xff] %v295_v30 }
  0x23   :  { %330 = vst [vmem:[%s765_s3 + $0x100] sm:$0xff] %v296_v37  ;;  %331 = vst [vmem:[%s765_s3 + $0x108] sm:$0xff] %v297_v42 }

</bundles_post_ra>
